<compile_context>
chip_gen: v6e
topology: v6e:2x2x1
jax: 0.10.0
libtpu: 0.0.40
codegen_flags: <defaults>
</compile_context>

<pallas_src>
import functools
import math

import jax
import jax.numpy as jnp
from jax.experimental import pallas as pl
from jax.experimental.pallas import tpu as pltpu

# ----------------------------- model dims -----------------------------------
B = 2          # batch
NQ = 8         # query length
NK = 8         # key/value length
D_MODEL = 32
H = 4          # heads
DK = 8         # per-head query/key dim
DV = 8         # per-head value dim
LN_EPS = 1e-5
NEG_INF = -1e30


# ------------------------------- kernel --------------------------------------
def mha_kernel(mask_ref, q_ref, k_ref, v_ref,
               wq_ref, bq_ref, wk_ref, bk_ref, wv_ref, bv_ref,
               wo_ref, bo_ref, gamma_ref, beta_ref, out_ref,
               *, h, d_k, d_v):
    q_in = q_ref[...]            # (B*NQ, D_MODEL)
    k_in = k_ref[...]            # (B*NK, D_MODEL)
    v_in = v_ref[...]            # (B*NK, D_MODEL)
    mask_bias = mask_ref[...]    # (B*NQ, B*NK) additive bias, -1e30 == masked

    # fused input projections over all batch rows (bias broadcast added once)
    q = jnp.dot(q_in, wq_ref[...], preferred_element_type=jnp.float32) + bq_ref[...]
    k = jnp.dot(k_in, wk_ref[...], preferred_element_type=jnp.float32) + bk_ref[...]
    v = jnp.dot(v_in, wv_ref[...], preferred_element_type=jnp.float32) + bv_ref[...]

    # fold the 1/sqrt(d_k) scale into q once (instead of per-head on the scores)
    q = q * jnp.float32(1.0 / math.sqrt(d_k))

    n_rows, d_model = out_ref.shape
    attn_out = jnp.zeros((n_rows, d_model), jnp.float32)

    # static unroll over heads: each head handles ALL batch rows at once; the
    # block-diagonal mask bias keeps batches from attending to each other.
    for hh in range(h):
        qh = q[:, hh * d_k:(hh + 1) * d_k]          # (B*NQ, DK)
        kh = k[:, hh * d_k:(hh + 1) * d_k]          # (B*NK, DK)
        vh = v[:, hh * d_v:(hh + 1) * d_v]          # (B*NK, DV)

        # scores = qh @ kh^T without materializing a transpose
        s = jax.lax.dot_general(qh, kh, (((1,), (1,)), ((), ())),
                                preferred_element_type=jnp.float32)
        s = s + mask_bias                            # one add, no per-head selects
        s = s - jnp.max(s, axis=-1, keepdims=True)
        p = jnp.exp(s)                               # masked entries -> exactly 0
        p = p * pl.reciprocal(jnp.sum(p, axis=-1, keepdims=True), approx=True)

        ctx = jnp.dot(p, vh, preferred_element_type=jnp.float32)   # (B*NQ, DV)
        # fold the output projection: no concat over heads, accumulate partials
        attn_out = attn_out + jnp.dot(
            ctx, wo_ref[hh * d_v:(hh + 1) * d_v, :],
            preferred_element_type=jnp.float32)

    attn_out = attn_out + bo_ref[...]

    # dropout is identity at inference; residual + LayerNorm over d_model
    x = q_in + attn_out
    mean = jnp.mean(x, axis=-1, keepdims=True)
    var = jnp.mean((x - mean) ** 2, axis=-1, keepdims=True)
    y = (x - mean) * jax.lax.rsqrt(var + LN_EPS)
    out_ref[...] = (y * gamma_ref[...] + beta_ref[...]).astype(out_ref.dtype)


# ------------------------------- wrapper --------------------------------------
def multi_head_attention(queries, keys, values, attention_mask, params):
    """queries: (B,NQ,D), keys/values: (B,NK,D), attention_mask: (B,NQ,NK) int32
    (nonzero == masked, matching torch masked_fill)."""
    b, nq, d = queries.shape
    nk = keys.shape[1]

    # flatten batch into rows (free, row-major)
    q_flat = queries.reshape(b * nq, d)
    k_flat = keys.reshape(b * nk, d)
    v_flat = values.reshape(b * nk, d)

    # additive mask bias, block-diagonal over batch:
    #   same batch & unmasked -> 0.0 ; masked or cross-batch -> -1e30
    b_idx = jnp.arange(b)
    same_batch = b_idx[:, None, None, None] == b_idx[None, None, :, None]  # (b,1,b,1)
    mask_bias = jnp.where(same_batch & (attention_mask[:, :, None, :] == 0),
                          0.0, NEG_INF).astype(jnp.float32)                # (b,nq,b,nk)
    mask_bias = mask_bias.reshape(b * nq, b * nk)

    kernel = functools.partial(mha_kernel, h=H, d_k=DK, d_v=DV)
    vmem = pl.BlockSpec(memory_space=pltpu.MemorySpace.VMEM)

    out_flat = pl.pallas_call(
        kernel,
        out_shape=jax.ShapeDtypeStruct((b * nq, d), jnp.float32),
        in_specs=[vmem] * 14,
        out_specs=vmem,
    )(mask_bias, q_flat, k_flat, v_flat,
      params["wq_t"], params["bq"], params["wk_t"], params["bk"],
      params["wv_t"], params["bv"], params["wo_t"], params["bo"],
      params["gamma"], params["beta"])

    return out_flat.reshape(b, nq, d)


# --------------------------- deterministic init --------------------------------
def xavier_uniform(key, out_features, in_features):
    # torch nn.Linear weight shape (out, in); xavier bound sqrt(6/(fan_in+fan_out))
    bound = math.sqrt(6.0 / (in_features + out_features))
    return jax.random.uniform(key, (out_features, in_features), jnp.float32,
                              minval=-bound, maxval=bound)


def init_params(key):
    k_q, k_k, k_v, k_o = jax.random.split(key, 4)
    wq = xavier_uniform(k_q, H * DK, D_MODEL)
    wk = xavier_uniform(k_k, H * DK, D_MODEL)
    wv = xavier_uniform(k_v, H * DV, D_MODEL)
    wo = xavier_uniform(k_o, D_MODEL, H * DV)
    return {
        # pre-transpose so the kernel computes x @ W
        "wq_t": wq.T, "bq": jnp.zeros((1, H * DK), jnp.float32),
        "wk_t": wk.T, "bk": jnp.zeros((1, H * DK), jnp.float32),
        "wv_t": wv.T, "bv": jnp.zeros((1, H * DV), jnp.float32),
        "wo_t": wo.T, "bo": jnp.zeros((1, D_MODEL), jnp.float32),
        "gamma": jnp.ones((1, D_MODEL), jnp.float32),
        "beta": jnp.zeros((1, D_MODEL), jnp.float32),
    }


# ------------------------------- reference -------------------------------------
def reference(queries, keys, values, mask, p):
    q = queries @ p["wq_t"] + p["bq"][0]
    k = keys @ p["wk_t"] + p["bk"][0]
    v = values @ p["wv_t"] + p["bv"][0]
    q = q.reshape(B, NQ, H, DK).transpose(0, 2, 1, 3)
    k = k.reshape(B, NK, H, DK).transpose(0, 2, 3, 1)
    v = v.reshape(B, NK, H, DV).transpose(0, 2, 1, 3)
    att = (q @ k) / math.sqrt(DK)
    att = jnp.where(mask[:, None, :, :] > 0, -jnp.inf, att)
    att = jax.nn.softmax(att, axis=-1)
    out = (att @ v).transpose(0, 2, 1, 3).reshape(B, NQ, H * DV)
    out = out @ p["wo_t"] + p["bo"][0]
    x = queries + out
    mean = jnp.mean(x, axis=-1, keepdims=True)
    var = jnp.mean((x - mean) ** 2, axis=-1, keepdims=True)
    return (x - mean) * jax.lax.rsqrt(var + LN_EPS) * p["gamma"][0] + p["beta"][0]


# --------------------------------- main -----------------------------------------
if __name__ == "__main__":
    key = jax.random.PRNGKey(0)
    k_params, k_q, k_k, k_v = jax.random.split(key, 4)

    params = init_params(k_params)
    queries = jax.random.normal(k_q, (B, NQ, D_MODEL), jnp.float32)
    keys = jax.random.normal(k_k, (B, NK, D_MODEL), jnp.float32)
    values = jax.random.normal(k_v, (B, NK, D_MODEL), jnp.float32)

    # simple causal-ish mask: mask out future keys (nonzero == masked)
    mask = (jnp.arange(NK)[None, :] > jnp.arange(NQ)[:, None]).astype(jnp.int32)
    mask = jnp.broadcast_to(mask[None], (B, NQ, NK))

    out = multi_head_attention(queries, keys, values, mask, params)
    out = jax.block_until_ready(out)

    ref = reference(queries, keys, values, mask, params)
    # tolerance loosened slightly vs exact math: softmax normalization uses the
    # EUP approximate reciprocal (pl.reciprocal(..., approx=True)).
    assert jnp.allclose(out, ref, atol=5e-3, rtol=5e-3), "mismatch vs JAX reference"

    print("KERNEL_OK")
</pallas_src>

<mosaic_0001>
module attributes {stable_mosaic.version = 11 : i64} {
  func.func @mha_kernel(%arg0: memref<16x16xf32, #tpu.memory_space<vmem>>, %arg1: memref<16x32xf32, #tpu.memory_space<vmem>>, %arg2: memref<16x32xf32, #tpu.memory_space<vmem>>, %arg3: memref<16x32xf32, #tpu.memory_space<vmem>>, %arg4: memref<32x32xf32, #tpu.memory_space<vmem>>, %arg5: memref<1x32xf32, #tpu.memory_space<vmem>>, %arg6: memref<32x32xf32, #tpu.memory_space<vmem>>, %arg7: memref<1x32xf32, #tpu.memory_space<vmem>>, %arg8: memref<32x32xf32, #tpu.memory_space<vmem>>, %arg9: memref<1x32xf32, #tpu.memory_space<vmem>>, %arg10: memref<32x32xf32, #tpu.memory_space<vmem>>, %arg11: memref<1x32xf32, #tpu.memory_space<vmem>>, %arg12: memref<1x32xf32, #tpu.memory_space<vmem>>, %arg13: memref<1x32xf32, #tpu.memory_space<vmem>>, %arg14: memref<16x32xf32, #tpu.memory_space<vmem>>) attributes {dimension_semantics = [], scalar_prefetch = 0 : i64, scratch_operands = 0 : i64, tpu.core_type = #tpu.core_type<tc>} {
    %c0 = arith.constant 0 : index
    %c0_0 = arith.constant 0 : index
    %0 = vector.load %arg1[%c0, %c0_0] : memref<16x32xf32, #tpu.memory_space<vmem>>, vector<16x32xf32>
    %c0_1 = arith.constant 0 : index
    %c0_2 = arith.constant 0 : index
    %1 = vector.load %arg2[%c0_1, %c0_2] : memref<16x32xf32, #tpu.memory_space<vmem>>, vector<16x32xf32>
    %c0_3 = arith.constant 0 : index
    %c0_4 = arith.constant 0 : index
    %2 = vector.load %arg3[%c0_3, %c0_4] : memref<16x32xf32, #tpu.memory_space<vmem>>, vector<16x32xf32>
    %c0_5 = arith.constant 0 : index
    %c0_6 = arith.constant 0 : index
    %3 = vector.load %arg0[%c0_5, %c0_6] : memref<16x16xf32, #tpu.memory_space<vmem>>, vector<16x16xf32>
    %c0_7 = arith.constant 0 : index
    %c0_8 = arith.constant 0 : index
    %4 = vector.load %arg4[%c0_7, %c0_8] : memref<32x32xf32, #tpu.memory_space<vmem>>, vector<32x32xf32>
    %cst = arith.constant dense<0.000000e+00> : vector<16x32xf32>
    %5 = tpu.matmul %0, %4, %cst {dimension_numbers = #tpu.dot_dimension_numbers<[1], [0], [0], [1], [0, 0, 1, 1], [], []>} : vector<16x32xf32>, vector<32x32xf32>, vector<16x32xf32> -> vector<16x32xf32>
    %c0_9 = arith.constant 0 : index
    %c0_10 = arith.constant 0 : index
    %6 = vector.load %arg5[%c0_9, %c0_10] : memref<1x32xf32, #tpu.memory_space<vmem>>, vector<1x32xf32>
    %7 = vector.broadcast %6 : vector<1x32xf32> to vector<16x32xf32>
    %8 = arith.addf %5, %7 : vector<16x32xf32>
    %c0_11 = arith.constant 0 : index
    %c0_12 = arith.constant 0 : index
    %9 = vector.load %arg6[%c0_11, %c0_12] : memref<32x32xf32, #tpu.memory_space<vmem>>, vector<32x32xf32>
    %cst_13 = arith.constant dense<0.000000e+00> : vector<16x32xf32>
    %10 = tpu.matmul %1, %9, %cst_13 {dimension_numbers = #tpu.dot_dimension_numbers<[1], [0], [0], [1], [0, 0, 1, 1], [], []>} : vector<16x32xf32>, vector<32x32xf32>, vector<16x32xf32> -> vector<16x32xf32>
    %c0_14 = arith.constant 0 : index
    %c0_15 = arith.constant 0 : index
    %11 = vector.load %arg7[%c0_14, %c0_15] : memref<1x32xf32, #tpu.memory_space<vmem>>, vector<1x32xf32>
    %12 = vector.broadcast %11 : vector<1x32xf32> to vector<16x32xf32>
    %13 = arith.addf %10, %12 : vector<16x32xf32>
    %c0_16 = arith.constant 0 : index
    %c0_17 = arith.constant 0 : index
    %14 = vector.load %arg8[%c0_16, %c0_17] : memref<32x32xf32, #tpu.memory_space<vmem>>, vector<32x32xf32>
    %cst_18 = arith.constant dense<0.000000e+00> : vector<16x32xf32>
    %15 = tpu.matmul %2, %14, %cst_18 {dimension_numbers = #tpu.dot_dimension_numbers<[1], [0], [0], [1], [0, 0, 1, 1], [], []>} : vector<16x32xf32>, vector<32x32xf32>, vector<16x32xf32> -> vector<16x32xf32>
    %c0_19 = arith.constant 0 : index
    %c0_20 = arith.constant 0 : index
    %16 = vector.load %arg9[%c0_19, %c0_20] : memref<1x32xf32, #tpu.memory_space<vmem>>, vector<1x32xf32>
    %17 = vector.broadcast %16 : vector<1x32xf32> to vector<16x32xf32>
    %18 = arith.addf %15, %17 : vector<16x32xf32>
    %cst_21 = arith.constant 0.353553385 : f32
    %19 = vector.broadcast %cst_21 : f32 to vector<16x32xf32>
    %20 = arith.mulf %8, %19 : vector<16x32xf32>
    %cst_22 = arith.constant 0.000000e+00 : f32
    %21 = vector.broadcast %cst_22 : f32 to vector<16x32xf32>
    %22 = vector.extract_strided_slice %20 {offsets = [0, 0], sizes = [16, 8], strides = [1, 1]} : vector<16x32xf32> to vector<16x8xf32>
    %23 = vector.extract_strided_slice %13 {offsets = [0, 0], sizes = [16, 8], strides = [1, 1]} : vector<16x32xf32> to vector<16x8xf32>
    %24 = vector.extract_strided_slice %18 {offsets = [0, 0], sizes = [16, 8], strides = [1, 1]} : vector<16x32xf32> to vector<16x8xf32>
    %cst_23 = arith.constant dense<0.000000e+00> : vector<16x16xf32>
    %25 = tpu.matmul %22, %23, %cst_23 {dimension_numbers = #tpu.dot_dimension_numbers<[1], [1], [0], [0], [0, 0, 1, 0], [], []>} : vector<16x8xf32>, vector<16x8xf32>, vector<16x16xf32> -> vector<16x16xf32>
    %26 = arith.addf %25, %3 : vector<16x16xf32>
    %cst_24 = arith.constant dense<0xFF800000> : vector<16xf32>
    %27 = vector.multi_reduction <maximumf>, %26, %cst_24 [1] : vector<16x16xf32> to vector<16xf32>
    %28 = vector.shape_cast %27 : vector<16xf32> to vector<16x1xf32>
    %29 = vector.broadcast %28 : vector<16x1xf32> to vector<16x16xf32>
    %30 = arith.subf %26, %29 : vector<16x16xf32>
    %31 = math.exp %30 : vector<16x16xf32>
    %cst_25 = arith.constant dense<0.000000e+00> : vector<16xf32>
    %32 = vector.multi_reduction <add>, %31, %cst_25 [1] : vector<16x16xf32> to vector<16xf32>
    %33 = vector.shape_cast %32 : vector<16xf32> to vector<16x1xf32>
    %34 = tpu.reciprocal %33 {approx = true} : vector<16x1xf32> -> vector<16x1xf32>
    %35 = vector.broadcast %34 : vector<16x1xf32> to vector<16x16xf32>
    %36 = arith.mulf %31, %35 : vector<16x16xf32>
    %cst_26 = arith.constant dense<0.000000e+00> : vector<16x8xf32>
    %37 = tpu.matmul %36, %24, %cst_26 {dimension_numbers = #tpu.dot_dimension_numbers<[1], [0], [0], [1], [0, 0, 1, 1], [], []>} : vector<16x16xf32>, vector<16x8xf32>, vector<16x8xf32> -> vector<16x8xf32>
    %c0_27 = arith.constant 0 : index
    %c0_28 = arith.constant 0 : index
    %38 = vector.load %arg10[%c0_27, %c0_28] : memref<32x32xf32, #tpu.memory_space<vmem>>, vector<8x32xf32>
    %cst_29 = arith.constant dense<0.000000e+00> : vector<16x32xf32>
    %39 = tpu.matmul %37, %38, %cst_29 {dimension_numbers = #tpu.dot_dimension_numbers<[1], [0], [0], [1], [0, 0, 1, 1], [], []>} : vector<16x8xf32>, vector<8x32xf32>, vector<16x32xf32> -> vector<16x32xf32>
    %40 = arith.addf %21, %39 : vector<16x32xf32>
    %41 = vector.extract_strided_slice %20 {offsets = [0, 8], sizes = [16, 8], strides = [1, 1]} : vector<16x32xf32> to vector<16x8xf32>
    %42 = vector.extract_strided_slice %13 {offsets = [0, 8], sizes = [16, 8], strides = [1, 1]} : vector<16x32xf32> to vector<16x8xf32>
    %43 = vector.extract_strided_slice %18 {offsets = [0, 8], sizes = [16, 8], strides = [1, 1]} : vector<16x32xf32> to vector<16x8xf32>
    %cst_30 = arith.constant dense<0.000000e+00> : vector<16x16xf32>
    %44 = tpu.matmul %41, %42, %cst_30 {dimension_numbers = #tpu.dot_dimension_numbers<[1], [1], [0], [0], [0, 0, 1, 0], [], []>} : vector<16x8xf32>, vector<16x8xf32>, vector<16x16xf32> -> vector<16x16xf32>
    %45 = arith.addf %44, %3 : vector<16x16xf32>
    %cst_31 = arith.constant dense<0xFF800000> : vector<16xf32>
    %46 = vector.multi_reduction <maximumf>, %45, %cst_31 [1] : vector<16x16xf32> to vector<16xf32>
    %47 = vector.shape_cast %46 : vector<16xf32> to vector<16x1xf32>
    %48 = vector.broadcast %47 : vector<16x1xf32> to vector<16x16xf32>
    %49 = arith.subf %45, %48 : vector<16x16xf32>
    %50 = math.exp %49 : vector<16x16xf32>
    %cst_32 = arith.constant dense<0.000000e+00> : vector<16xf32>
    %51 = vector.multi_reduction <add>, %50, %cst_32 [1] : vector<16x16xf32> to vector<16xf32>
    %52 = vector.shape_cast %51 : vector<16xf32> to vector<16x1xf32>
    %53 = tpu.reciprocal %52 {approx = true} : vector<16x1xf32> -> vector<16x1xf32>
    %54 = vector.broadcast %53 : vector<16x1xf32> to vector<16x16xf32>
    %55 = arith.mulf %50, %54 : vector<16x16xf32>
    %cst_33 = arith.constant dense<0.000000e+00> : vector<16x8xf32>
    %56 = tpu.matmul %55, %43, %cst_33 {dimension_numbers = #tpu.dot_dimension_numbers<[1], [0], [0], [1], [0, 0, 1, 1], [], []>} : vector<16x16xf32>, vector<16x8xf32>, vector<16x8xf32> -> vector<16x8xf32>
    %c8 = arith.constant 8 : index
    %c0_34 = arith.constant 0 : index
    %57 = vector.load %arg10[%c8, %c0_34] : memref<32x32xf32, #tpu.memory_space<vmem>>, vector<8x32xf32>
    %cst_35 = arith.constant dense<0.000000e+00> : vector<16x32xf32>
    %58 = tpu.matmul %56, %57, %cst_35 {dimension_numbers = #tpu.dot_dimension_numbers<[1], [0], [0], [1], [0, 0, 1, 1], [], []>} : vector<16x8xf32>, vector<8x32xf32>, vector<16x32xf32> -> vector<16x32xf32>
    %59 = arith.addf %40, %58 : vector<16x32xf32>
    %60 = vector.extract_strided_slice %20 {offsets = [0, 16], sizes = [16, 8], strides = [1, 1]} : vector<16x32xf32> to vector<16x8xf32>
    %61 = vector.extract_strided_slice %13 {offsets = [0, 16], sizes = [16, 8], strides = [1, 1]} : vector<16x32xf32> to vector<16x8xf32>
    %62 = vector.extract_strided_slice %18 {offsets = [0, 16], sizes = [16, 8], strides = [1, 1]} : vector<16x32xf32> to vector<16x8xf32>
    %cst_36 = arith.constant dense<0.000000e+00> : vector<16x16xf32>
    %63 = tpu.matmul %60, %61, %cst_36 {dimension_numbers = #tpu.dot_dimension_numbers<[1], [1], [0], [0], [0, 0, 1, 0], [], []>} : vector<16x8xf32>, vector<16x8xf32>, vector<16x16xf32> -> vector<16x16xf32>
    %64 = arith.addf %63, %3 : vector<16x16xf32>
    %cst_37 = arith.constant dense<0xFF800000> : vector<16xf32>
    %65 = vector.multi_reduction <maximumf>, %64, %cst_37 [1] : vector<16x16xf32> to vector<16xf32>
    %66 = vector.shape_cast %65 : vector<16xf32> to vector<16x1xf32>
    %67 = vector.broadcast %66 : vector<16x1xf32> to vector<16x16xf32>
    %68 = arith.subf %64, %67 : vector<16x16xf32>
    %69 = math.exp %68 : vector<16x16xf32>
    %cst_38 = arith.constant dense<0.000000e+00> : vector<16xf32>
    %70 = vector.multi_reduction <add>, %69, %cst_38 [1] : vector<16x16xf32> to vector<16xf32>
    %71 = vector.shape_cast %70 : vector<16xf32> to vector<16x1xf32>
    %72 = tpu.reciprocal %71 {approx = true} : vector<16x1xf32> -> vector<16x1xf32>
    %73 = vector.broadcast %72 : vector<16x1xf32> to vector<16x16xf32>
    %74 = arith.mulf %69, %73 : vector<16x16xf32>
    %cst_39 = arith.constant dense<0.000000e+00> : vector<16x8xf32>
    %75 = tpu.matmul %74, %62, %cst_39 {dimension_numbers = #tpu.dot_dimension_numbers<[1], [0], [0], [1], [0, 0, 1, 1], [], []>} : vector<16x16xf32>, vector<16x8xf32>, vector<16x8xf32> -> vector<16x8xf32>
    %c16 = arith.constant 16 : index
    %c0_40 = arith.constant 0 : index
    %76 = vector.load %arg10[%c16, %c0_40] : memref<32x32xf32, #tpu.memory_space<vmem>>, vector<8x32xf32>
    %cst_41 = arith.constant dense<0.000000e+00> : vector<16x32xf32>
    %77 = tpu.matmul %75, %76, %cst_41 {dimension_numbers = #tpu.dot_dimension_numbers<[1], [0], [0], [1], [0, 0, 1, 1], [], []>} : vector<16x8xf32>, vector<8x32xf32>, vector<16x32xf32> -> vector<16x32xf32>
    %78 = arith.addf %59, %77 : vector<16x32xf32>
    %79 = vector.extract_strided_slice %20 {offsets = [0, 24], sizes = [16, 8], strides = [1, 1]} : vector<16x32xf32> to vector<16x8xf32>
    %80 = vector.extract_strided_slice %13 {offsets = [0, 24], sizes = [16, 8], strides = [1, 1]} : vector<16x32xf32> to vector<16x8xf32>
    %81 = vector.extract_strided_slice %18 {offsets = [0, 24], sizes = [16, 8], strides = [1, 1]} : vector<16x32xf32> to vector<16x8xf32>
    %cst_42 = arith.constant dense<0.000000e+00> : vector<16x16xf32>
    %82 = tpu.matmul %79, %80, %cst_42 {dimension_numbers = #tpu.dot_dimension_numbers<[1], [1], [0], [0], [0, 0, 1, 0], [], []>} : vector<16x8xf32>, vector<16x8xf32>, vector<16x16xf32> -> vector<16x16xf32>
    %83 = arith.addf %82, %3 : vector<16x16xf32>
    %cst_43 = arith.constant dense<0xFF800000> : vector<16xf32>
    %84 = vector.multi_reduction <maximumf>, %83, %cst_43 [1] : vector<16x16xf32> to vector<16xf32>
    %85 = vector.shape_cast %84 : vector<16xf32> to vector<16x1xf32>
    %86 = vector.broadcast %85 : vector<16x1xf32> to vector<16x16xf32>
    %87 = arith.subf %83, %86 : vector<16x16xf32>
    %88 = math.exp %87 : vector<16x16xf32>
    %cst_44 = arith.constant dense<0.000000e+00> : vector<16xf32>
    %89 = vector.multi_reduction <add>, %88, %cst_44 [1] : vector<16x16xf32> to vector<16xf32>
    %90 = vector.shape_cast %89 : vector<16xf32> to vector<16x1xf32>
    %91 = tpu.reciprocal %90 {approx = true} : vector<16x1xf32> -> vector<16x1xf32>
    %92 = vector.broadcast %91 : vector<16x1xf32> to vector<16x16xf32>
    %93 = arith.mulf %88, %92 : vector<16x16xf32>
    %cst_45 = arith.constant dense<0.000000e+00> : vector<16x8xf32>
    %94 = tpu.matmul %93, %81, %cst_45 {dimension_numbers = #tpu.dot_dimension_numbers<[1], [0], [0], [1], [0, 0, 1, 1], [], []>} : vector<16x16xf32>, vector<16x8xf32>, vector<16x8xf32> -> vector<16x8xf32>
    %c24 = arith.constant 24 : index
    %c0_46 = arith.constant 0 : index
    %95 = vector.load %arg10[%c24, %c0_46] : memref<32x32xf32, #tpu.memory_space<vmem>>, vector<8x32xf32>
    %cst_47 = arith.constant dense<0.000000e+00> : vector<16x32xf32>
    %96 = tpu.matmul %94, %95, %cst_47 {dimension_numbers = #tpu.dot_dimension_numbers<[1], [0], [0], [1], [0, 0, 1, 1], [], []>} : vector<16x8xf32>, vector<8x32xf32>, vector<16x32xf32> -> vector<16x32xf32>
    %97 = arith.addf %78, %96 : vector<16x32xf32>
    %c0_48 = arith.constant 0 : index
    %c0_49 = arith.constant 0 : index
    %98 = vector.load %arg11[%c0_48, %c0_49] : memref<1x32xf32, #tpu.memory_space<vmem>>, vector<1x32xf32>
    %99 = vector.broadcast %98 : vector<1x32xf32> to vector<16x32xf32>
    %100 = arith.addf %97, %99 : vector<16x32xf32>
    %101 = arith.addf %0, %100 : vector<16x32xf32>
    %cst_50 = arith.constant dense<0.000000e+00> : vector<16xf32>
    %102 = vector.multi_reduction <add>, %101, %cst_50 [1] : vector<16x32xf32> to vector<16xf32>
    %103 = vector.shape_cast %102 : vector<16xf32> to vector<16x1xf32>
    %cst_51 = arith.constant 3.200000e+01 : f32
    %104 = vector.broadcast %cst_51 : f32 to vector<16x1xf32>
    %105 = arith.divf %103, %104 : vector<16x1xf32>
    %106 = vector.broadcast %105 : vector<16x1xf32> to vector<16x32xf32>
    %107 = arith.subf %101, %106 : vector<16x32xf32>
    %108 = arith.mulf %107, %107 : vector<16x32xf32>
    %cst_52 = arith.constant dense<0.000000e+00> : vector<16xf32>
    %109 = vector.multi_reduction <add>, %108, %cst_52 [1] : vector<16x32xf32> to vector<16xf32>
    %110 = vector.shape_cast %109 : vector<16xf32> to vector<16x1xf32>
    %cst_53 = arith.constant 3.200000e+01 : f32
    %111 = vector.broadcast %cst_53 : f32 to vector<16x1xf32>
    %112 = arith.divf %110, %111 : vector<16x1xf32>
    %113 = vector.broadcast %105 : vector<16x1xf32> to vector<16x32xf32>
    %114 = arith.subf %101, %113 : vector<16x32xf32>
    %cst_54 = arith.constant 9.99999974E-6 : f32
    %115 = vector.broadcast %cst_54 : f32 to vector<16x1xf32>
    %116 = arith.addf %112, %115 : vector<16x1xf32>
    %117 = math.rsqrt %116 : vector<16x1xf32>
    %118 = vector.broadcast %117 : vector<16x1xf32> to vector<16x32xf32>
    %119 = arith.mulf %114, %118 : vector<16x32xf32>
    %c0_55 = arith.constant 0 : index
    %c0_56 = arith.constant 0 : index
    %120 = vector.load %arg12[%c0_55, %c0_56] : memref<1x32xf32, #tpu.memory_space<vmem>>, vector<1x32xf32>
    %121 = vector.broadcast %120 : vector<1x32xf32> to vector<16x32xf32>
    %122 = arith.mulf %119, %121 : vector<16x32xf32>
    %c0_57 = arith.constant 0 : index
    %c0_58 = arith.constant 0 : index
    %123 = vector.load %arg13[%c0_57, %c0_58] : memref<1x32xf32, #tpu.memory_space<vmem>>, vector<1x32xf32>
    %124 = vector.broadcast %123 : vector<1x32xf32> to vector<16x32xf32>
    %125 = arith.addf %122, %124 : vector<16x32xf32>
    %c0_59 = arith.constant 0 : index
    %c0_60 = arith.constant 0 : index
    %126 = vector.load %arg14[%c0_59, %c0_60] : memref<16x32xf32, #tpu.memory_space<vmem>>, vector<16x32xf32>
    tpu.vector_store %arg14[%c0_59, %c0_60], %125 {strides = array<i32>} : memref<16x32xf32, #tpu.memory_space<vmem>>, vector<16x32xf32>,
    return
  }
}

</mosaic_0001>

<bundles_post_ra>
// kernel: tpu_custom_call.1
= control target key start
LH: loop header
LB: loop body
LE: loop exit
PB: predicated region body
PF: predicated region fallthrough
CT: control target
= control target key end

     0   :  { %19 = vsyncpa [#allocation3], 0  ;;  %s2419_s0 = inlined_call_operand.hbm [shape: f32[16,16], index: 0, kind: input, shape index: {}]   ;;  %s2420_s1 = inlined_call_operand.hbm [shape: f32[16,32], index: 1, kind: input, shape index: {}]   ;;  %s2421_s2 = inlined_call_operand.hbm [shape: f32[16,32], index: 2, kind: input, shape index: {}]   ;;  %s2422_s3 = inlined_call_operand.hbm [shape: f32[16,32], index: 3, kind: input, shape index: {}]   ;;  %s2423_s4 = inlined_call_operand.hbm [shape: f32[32,32], index: 4, kind: input, shape index: {}]   ;;  %s2424_s5 = inlined_call_operand.vmem [shape: f32[1,32], index: 5, kind: input, shape index: {}]   ;;  %s2425_s6 = inlined_call_operand.hbm [shape: f32[32,32], index: 6, kind: input, shape index: {}]   ;;  %s2426_s7 = inlined_call_operand.vmem [shape: f32[1,32], index: 7, kind: input, shape index: {}]   ;;  %s2427_s8 = inlined_call_operand.hbm [shape: f32[32,32], index: 8, kind: input, shape index: {}]   ;;  %s2428_s9 = inlined_call_operand.vmem [shape: f32[1,32], index: 9, kind: input, shape index: {}]   ;;  %s2429_s10 = inlined_call_operand.hbm [shape: f32[32,32], index: 10, kind: input, shape index: {}]   ;;  %s2430_s11 = inlined_call_operand.vmem [shape: f32[1,32], index: 11, kind: input, shape index: {}]   ;;  %s2431_s12 = inlined_call_operand.vmem [shape: f32[1,32], index: 12, kind: input, shape index: {}]   ;;  %s2432_s13 = inlined_call_operand.vmem [shape: f32[1,32], index: 13, kind: input, shape index: {}]   ;;  %s2433_s14 = inlined_call_operand.hbm [shape: f32[16,32], index: 14, kind: output, shape index: {}]  }
   0x1   :  { %20 = vsyncpa [#allocation6], 0 }
   0x2   :  { %21 = vsyncpa [#allocation9], 0 }
   0x3   :  { %22 = vsyncpa [#allocation12], 0 }
   0x4   :  { %23 = vsyncpa [#allocation15], 0 }
   0x5   :  { %24 = vsyncpa [#allocation4], 0  ;;  %s2106_s29 = smov [#allocation5]   ;;  %s2107_s15 = smov [#allocation8]  }
   0x6   :  { %s42_s30 = sshll.u32 %s2106_s29, 4  ;;  %s66_s16 = sshll.u32 %s2107_s15, 4  ;;  %s43_s30 = int_to_ptr.vmem [resolvable:$true] %s42_s30  ;;  %s67_s16 = int_to_ptr.vmem [resolvable:$true] %s66_s16 }
   0x7   :  { %s1922_s17 = scalar_lea.vmem %s43_s30, 256  ;;  %p1927_p1 = scmp.lt.s32.totalorder %s43_s30, %s43_s30 }
   0x8   :  { %p1923_p0 = scmp.ne.s32.totalorder %s43_s30, %s1922_s17  ;;  %p1928_p2 = scmp.lt.s32.totalorder %s1922_s17, %s1922_s17 }
   0xa   :  { %p1929_p3 = por %p1928_p2, %p1927_p1 }
   0xc   :  { %p1930_p4 = pnand %p1929_p3, %p1923_p0 }
   0xe   :  { %1933 = shalt.err (!%p1930_p4)
}
   0xf   :  { %s2108_s18 = smov 128   ;;  %s2109_s19 = smov 8  }
  0x10   :  { %48 = dma.hbm_to_vmem [thread:$0]  %s2420_s1, 256, %s43_s30, [#allocation6], %s2108_s18, %s2108_s18, %s2109_s19  }
  0x11   :  { %s1942_s22 = scalar_lea.vmem %s67_s16, 256  ;;  %p1947_p6 = scmp.lt.s32.totalorder %s67_s16, %s67_s16 }
  0x12   :  { %p1943_p5 = scmp.ne.s32.totalorder %s67_s16, %s1942_s22  ;;  %p1948_p7 = scmp.lt.s32.totalorder %s1942_s22, %s1942_s22 }
  0x14   :  { %p1949_p8 = por %p1948_p7, %p1947_p6 }
  0x16   :  { %p1950_p9 = pnand %p1949_p8, %p1943_p5 }
  0x18   :  { %1953 = shalt.err (!%p1950_p9)
}
  0x19   :  { %72 = dma.hbm_to_vmem [thread:$0]  %s2422_s3, 256, %s67_s16, [#allocation9], %s2108_s18, %s2108_s18, %s2109_s19  }
  0x1a   :  { %s2110_s25 = smov [#allocation11]   ;;  %s2111_s27 = smov [#allocation2]  }
  0x1b   :  { %s92_s26 = sshll.u32 %s2110_s25, 4  ;;  %s30_s28 = sshll.u32 %s2111_s27, 4  ;;  %s93_s26 = int_to_ptr.vmem [resolvable:$true] %s92_s26  ;;  %s31_s28 = int_to_ptr.vmem [resolvable:$true] %s30_s28 }
  0x1c   :  { %s1962_s1 = scalar_lea.vmem %s93_s26, 512  ;;  %p1967_p11 = scmp.lt.s32.totalorder %s93_s26, %s93_s26 }
  0x1d   :  { %p1963_p10 = scmp.ne.s32.totalorder %s93_s26, %s1962_s1  ;;  %p1968_p12 = scmp.lt.s32.totalorder %s1962_s1, %s1962_s1 }
  0x1f   :  { %p1969_p13 = por %p1968_p12, %p1967_p11 }
  0x21   :  { %p1970_p0 = pnand %p1969_p13, %p1963_p10 }
  0x23   :  { %1973 = shalt.err (!%p1970_p0)
}
  0x24   :  { %98 = dma.hbm_to_vmem [thread:$0]  %s2425_s6, 512, %s93_s26, [#allocation12], %s2108_s18, %s2108_s18, %s2109_s19  }
  0x25   :  { %s1982_s3 = scalar_lea.vmem %s31_s28, 256  ;;  %p1987_p2 = scmp.lt.s32.totalorder %s31_s28, %s31_s28 }
  0x26   :  { %p1983_p1 = scmp.ne.s32.totalorder %s31_s28, %s1982_s3  ;;  %p1988_p3 = scmp.lt.s32.totalorder %s1982_s3, %s1982_s3 }
  0x28   :  { %p1989_p4 = por %p1988_p3, %p1987_p2 }
  0x2a   :  { %p1990_p5 = pnand %p1989_p4, %p1983_p1 }
  0x2c   :  { %1993 = shalt.err (!%p1990_p5)
}
  0x2d   :  { %36 = dma.hbm_to_vmem [thread:$0]  %s2419_s0, 256, %s31_s28, [#allocation3], %s2108_s18, %s2108_s18, %s2109_s19  }
  0x2e   :  { %s2112_s17 = smov [#allocation7]   ;;  %s2113_s21 = smov [#allocation10]  }
  0x2f   :  { %s54_s20 = sshll.u32 %s2112_s17, 4  ;;  %s78_s22 = sshll.u32 %s2113_s21, 4  ;;  %s55_s20 = int_to_ptr.vmem [resolvable:$true] %s54_s20  ;;  %s79_s22 = int_to_ptr.vmem [resolvable:$true] %s78_s22 }
  0x30   :  { %s2002_s6 = scalar_lea.vmem %s55_s20, 256  ;;  %p2007_p7 = scmp.lt.s32.totalorder %s55_s20, %s55_s20 }
  0x31   :  { %p2003_p6 = scmp.ne.s32.totalorder %s55_s20, %s2002_s6  ;;  %p2008_p8 = scmp.lt.s32.totalorder %s2002_s6, %s2002_s6 }
  0x33   :  { %p2009_p9 = por %p2008_p8, %p2007_p7 }
  0x35   :  { %p2010_p10 = pnand %p2009_p9, %p2003_p6 }
  0x37   :  { %2013 = shalt.err (!%p2010_p10)
}
  0x38   :  { %60 = dma.hbm_to_vmem [thread:$0]  %s2421_s2, 256, %s55_s20, [#allocation6], %s2108_s18, %s2108_s18, %s2109_s19  }
  0x39   :  { %s2022_s0 = scalar_lea.vmem %s79_s22, 512  ;;  %p2027_p12 = scmp.lt.s32.totalorder %s79_s22, %s79_s22 }
  0x3a   :  { %p2023_p11 = scmp.ne.s32.totalorder %s79_s22, %s2022_s0  ;;  %p2028_p13 = scmp.lt.s32.totalorder %s2022_s0, %s2022_s0 }
  0x3c   :  { %p2029_p0 = por %p2028_p13, %p2027_p12 }
  0x3e   :  { %p2030_p1 = pnand %p2029_p0, %p2023_p11 }
  0x40   :  { %2033 = shalt.err (!%p2030_p1)
}
  0x41   :  { %84 = dma.hbm_to_vmem [thread:$0]  %s2423_s4, 512, %s79_s22, [#allocation9], %s2108_s18, %s2108_s18, %s2109_s19  }
  0x42   :  { %s2114_s27 = smov [#allocation13]   ;;  %s2115_s1 = smov [#allocation14]  }
  0x43   :  { %s106_s28 = sshll.u32 %s2114_s27, 4  ;;  %s120_s29 = sshll.u32 %s2115_s1, 4  ;;  %s107_s28 = int_to_ptr.vmem [resolvable:$true] %s106_s28  ;;  %s121_s29 = int_to_ptr.vmem [resolvable:$true] %s120_s29 }
  0x44   :  { %s2042_s2 = scalar_lea.vmem %s107_s28, 512  ;;  %p2047_p3 = scmp.lt.s32.totalorder %s107_s28, %s107_s28 }
  0x45   :  { %p2043_p2 = scmp.ne.s32.totalorder %s107_s28, %s2042_s2  ;;  %p2048_p4 = scmp.lt.s32.totalorder %s2042_s2, %s2042_s2 }
  0x47   :  { %p2049_p5 = por %p2048_p4, %p2047_p3 }
  0x49   :  { %p2050_p6 = pnand %p2049_p5, %p2043_p2 }
  0x4b   :  { %2053 = shalt.err (!%p2050_p6)
}
  0x4c   :  { %112 = dma.hbm_to_vmem [thread:$0]  %s2427_s8, 512, %s107_s28, [#allocation12], %s2108_s18, %s2108_s18, %s2109_s19  }
  0x4d   :  { %s2062_s4 = scalar_lea.vmem %s121_s29, 512  ;;  %p2067_p8 = scmp.lt.s32.totalorder %s121_s29, %s121_s29 }
  0x4e   :  { %p2063_p7 = scmp.ne.s32.totalorder %s121_s29, %s2062_s4  ;;  %p2068_p9 = scmp.lt.s32.totalorder %s2062_s4, %s2062_s4 }
  0x50   :  { %p2069_p10 = por %p2068_p9, %p2067_p8 }
  0x52   :  { %p2070_p11 = pnand %p2069_p10, %p2063_p7 }
  0x54   :  { %2073 = shalt.err (!%p2070_p11)
}
  0x55   :  { %126 = dma.hbm_to_vmem [thread:$0]  %s2429_s10, 512, %s121_s29, [#allocation15], %s2108_s18, %s2108_s18, %s2109_s19  }
  0x56   :  { %2094 = dma.done.wait [#allocation3], 256  }
  0x57   :  { %2095 = vsyncadd [#allocation3], 4294967040 }
  0x58   :  { %2096 = dma.done.wait [#allocation6], 512  }
  0x59   :  { %2097 = vsyncadd [#allocation6], 4294966784 }
  0x5a   :  { %2098 = dma.done.wait [#allocation9], 768  }
  0x5b   :  { %2099 = vsyncadd [#allocation9], 4294966528 }
  0x5c   :  { %2100 = dma.done.wait [#allocation12], 1024  }
  0x5d   :  { %2101 = vsyncadd [#allocation12], 4294966272 }
  0x5e   :  { %2102 = dma.done.wait [#allocation15], 512  }
  0x5f   :  { %2103 = vsyncadd [#allocation15], 4294966784  ;;  %v168_v0 = vld [vmem:[#allocation10 + $0x18] sm:$0xff]  ;;  %v167_v2 = vld [vmem:[#allocation10 + $0x10] sm:$0xff]  ;;  %vm176_vm0 = vcmask 261120   ;;  %vm444_vm1 = vcmask 64512  }
  0x60   :  { %v261_v1 = vld [vmem:[#allocation11 + $0x18] sm:$0xff]  ;;  %1755 = vmatprep.subr.mxu0 %v168_v0  ;;  %v260_v3 = vld [vmem:[#allocation11 + $0x10] sm:$0xff]  ;;  %v166_v4 = vld [vmem:[#allocation10 + $0x8] sm:$0xff]  ;;  %s2116_s21 = smov 120   ;;  %vm532_vm2 = vcmask 130048   ;;  %s2118_s22 = smov 104  }
  0x61   :  { %1766 = vmatprep.subr.mxu1 %v261_v1  ;;  %1756 = vmatpush3.msra.mxu0 %v168_v0  ;;  %v259_v5 = vld [vmem:[#allocation11 + $0x8] sm:$0xff]  ;;  %v165_v6 = vld [vmem:[#allocation10] sm:$0xff]  ;;  %v2243_v8 = vld [vmem:[#allocation5] sm:$0xff]  ;;  %s2119_s26 = smov [#allocation16]  }
  0x62   :  { %1767 = vmatpush3.msra.mxu1 %v261_v1  ;;  %1757 = vmatprep.subr.mxu0 %v167_v2  ;;  %v258_v7 = vld [vmem:[#allocation11] sm:$0xff]  ;;  %v2245_v10 = vld [vmem:[#allocation5 + $0x8] sm:$0xff]  ;;  %v160_v11 = vld [vmem:[#allocation7 + $0x8] sm:$0xff]  ;;  %s1633_s27 = sshll.u32 %s2119_s26, 4  ;;  %s1634_s27 = int_to_ptr.vmem [resolvable:$true] %s1633_s27 }
  0x63   :  { %1768 = vmatprep.subr.mxu1 %v260_v3  ;;  %1758 = vmatpush3.msra.mxu0 %v167_v2  ;;  %v159_v9 = vld [vmem:[#allocation7] sm:$0xff]  ;;  %v353_v24 = vld [vmem:[#allocation13 + $0x18] sm:$0xff]  ;;  %v352_v25 = vld [vmem:[#allocation13 + $0x10] sm:$0xff]  ;;  %s2074_s28 = scalar_lea.vmem %s1634_s27, 256  ;;  %p2079_p13 = scmp.lt.s32.totalorder %s1634_s27, %s1634_s27 }
  0x64   :  { %1769 = vmatpush3.msra.mxu1 %v260_v3  ;;  %1759 = vmatprep.subr.mxu0 %v166_v4  ;;  %v1652_v12 = vld [vmem:[%s2426_s7] ss:$0 sm:$0xff]  ;;  %v161_v26 = vld [vmem:[#allocation8] sm:$0xff]  ;;  %v351_v27 = vld [vmem:[#allocation13 + $0x8] sm:$0xff]  ;;  %p2075_p12 = scmp.ne.s32.totalorder %s1634_s27, %s2074_s28  ;;  %p2080_p0 = scmp.lt.s32.totalorder %s2074_s28, %s2074_s28 }
  0x65   :  { %1770 = vmatprep.subr.mxu1 %v259_v5  ;;  %1760 = vmatpush3.msra.mxu0 %v166_v4  ;;  %v1649_v16 = vld [vmem:[%s2424_s5] ss:$0 sm:$0xff]  ;;  %v162_v29 = vld [vmem:[#allocation8 + $0x8] sm:$0xff]  ;;  %v2295_v34 = vld [vmem:[#allocation2 + $0x8] sm:$0xff] }
  0x66   :  { %1771 = vmatpush3.msra.mxu1 %v259_v5  ;;  %1761 = vmatprep.subr.mxu0 %v165_v6  ;;  %v350_v28 = vld [vmem:[#allocation13] sm:$0xff]  ;;  %p2081_p1 = por %p2080_p0, %p2079_p13 }
  0x67   :  { %1772 = vmatprep.subr.mxu1 %v258_v7  ;;  %1762 = vmatpush3.msra.mxu0 %v165_v6  ;;  %v2297_v36 = vld [vmem:[#allocation2] sm:$0xff] }
  0x68   :  { %1763 = vmatprep.mubr.msk.f32.mxu0 %vm176_vm0, %v2243_v8  ;;  %1773 = vmatpush3.msra.mxu1 %v258_v7  ;;  %v1655_v55 = vld [vmem:[%s2428_s9] ss:$0 sm:$0xff]  ;;  %s2117_s9 = smov 112   ;;  %p2082_p2 = pnand %p2081_p1, %p2075_p12 }
  0x69   :  { %1774 = vmatprep.mubr.msk.f32.mxu1 %vm176_vm0, %v159_v9  ;;  %1764 = vmatmul.mubr.msk.f32.vlgmr.msra.gmra.mxu0 %vm176_vm0, %v2245_v10 }
  0x6a   :  { %1775 = vmatmul.mubr.msk.f32.vlgmr.msra.gmra.mxu1 %vm176_vm0, %v160_v11  ;;  %1777 = vmatprep.subr.mxu0 %v353_v24 }
  0x6b   :  { %1778 = vmatpush3.msra.mxu0 %v353_v24  ;;  %1785 = vmatprep.mubr.msk.f32.mxu0 %vm176_vm0, %v161_v26 }
  0x6c   :  { %1779 = vmatprep.subr.mxu0 %v352_v25 }
  0x6d   :  { %1780 = vmatpush3.msra.mxu0 %v352_v25 }
  0x6e   :  { %1781 = vmatprep.subr.mxu0 %v351_v27 }
  0x6f   :  { %1782 = vmatpush3.msra.mxu0 %v351_v27 }
  0x70   :  { %1783 = vmatprep.subr.mxu0 %v350_v28 }
  0x71   :  { %1784 = vmatpush3.msra.mxu0 %v350_v28 }
  0x72   :  { %1786 = vmatmul.mubr.msk.f32.vlgmr.msra.gmra.mxu0 %vm176_vm0, %v162_v29 }
 0x129   :  { %v1765_v13 = vpop.f32.mrf.mxu0 }
 0x12a   :  { %v1776_v14 = vpop.f32.mrf.mxu1  ;;  %v255_v21 = vadd.f32 %v1765_v13, %v1649_v16 }
 0x12b   :  { %v2256_v15 = vadd.f32 %v1776_v14, %v1652_v12  ;;  %v249_v17 = vpop.f32.mrf.mxu0 }
 0x12c   :  { %v341_v18 = vpop.f32.mrf.mxu1  ;;  %v250_v19 = vadd.f32 %v1649_v16, %v249_v17  ;;  %v2281_v23 = vmul.f32 0.35355338, %v255_v21 }
 0x12d   :  { %v2261_v20 = vadd.f32 %v1652_v12, %v341_v18  ;;  %643 = vrot.lane.b32.xlu0 %v2256_v15, %s2116_s21  ;;  %1788 = vmatprep.subr.msk.mxu1 %vm444_vm1, %v2256_v15  ;;  %v636_v18 = vld [vmem:[#allocation14] sm:$0xff] }
 0x12e   :  { %1789 = vmatpush3.xpose.msk.msra.mxu1 %vm444_vm1, %v2256_v15  ;;  %v2269_v22 = vmul.f32 0.35355338, %v250_v19 }
 0x12f   :  { %1790 = vmatprep.subr.msk.mxu1 %vm444_vm1, %v2261_v20 }
 0x130   :  { %637 = vrot.lane.b32.xlu1 %v2269_v22, %s2116_s21  ;;  %1792 = vmatprep.mubr.msk.f32.mxu1 %vm444_vm1, %v2269_v22 }
 0x131   :  { %641 = vrot.lane.b32.xlu0 %v2261_v20, %s2116_s21 }
 0x132   :  { %1791 = vmatpush3.xpose.msk.msra.mxu1 %vm444_vm1, %v2261_v20  ;;  %v1787_v54 = vpop.f32.mrf.mxu0 }
 0x133   :  { %v2310_v56 = vadd.f32 %v1787_v54, %v1655_v55 }
 0x134   :  { %639 = vrot.lane.b32.xlu1 %v2281_v23, %s2116_s21  ;;  %v433_v61 = vpop.f32.mrf.mxu0 }
 0x135   :  { %1793 = vmatmul.mubr.msk.f32.vlgmr.msra.gmra.mxu1 %vm444_vm1, %v2281_v23  ;;  %1795 = vmatprep.subr.mxu0 %v2310_v56  ;;  %v2316_v62 = vadd.f32 %v1655_v55, %v433_v61 }
 0x136   :  { %1796 = vmatpush3.msra.mxu0 %v2310_v56 }
 0x137   :  { %1797 = vmatprep.subr.mxu0 %v2316_v62 }
 0x138   :  { %1798 = vmatpush3.msra.mxu0 %v2316_v62 }
 0x19f   :  { %v644_v30 = vpop.permute.xlu0 %643 }
 0x1a0   :  { %1802 = vmatprep.subr.msk.mxu1 %vm444_vm1, %v644_v30 }
 0x1a1   :  { %1803 = vmatpush3.xpose.msk.msra.mxu1 %vm444_vm1, %v644_v30 }
 0x1a2   :  { %v638_v32 = vpop.permute.xlu1 %637 }
 0x1a3   :  { %v642_v31 = vpop.permute.xlu0 %641  ;;  %1806 = vmatprep.mubr.msk.f32.mxu1 %vm444_vm1, %v638_v32 }
 0x1a4   :  { %1804 = vmatprep.subr.msk.mxu1 %vm444_vm1, %v642_v31 }
 0x1a5   :  { %1805 = vmatpush3.xpose.msk.msra.mxu1 %vm444_vm1, %v642_v31 }
 0x1a6   :  { %v640_v33 = vpop.permute.xlu1 %639  ;;  %1821 = vmatprep.subr.mxu1 %v636_v18 }
 0x1a8   :  { %1807 = vmatmul.mubr.msk.f32.vlgmr.msra.gmra.mxu1 %vm444_vm1, %v640_v33 }
 0x1a9   :  { %1822 = vmatpush3.msra.mxu1 %v636_v18 }
 0x1f5   :  { %v1794_v35 = vpop.f32.mrf.mxu1 }
 0x1f6   :  { %v529_v37 = vadd.f32 %v1794_v35, %v2295_v34 }
 0x1f7   :  { %v523_v38 = vpop.f32.mrf.mxu1 }
 0x1f8   :  { %v524_v39 = vadd.f32 %v523_v38, %v2297_v36  ;;  %v536_v40 = vsel %vm532_vm2, %v529_v37, -inf }
 0x1f9   :  { %537 = vmax.xlane.f32.xlu1 %v536_v40 }
 0x1fa   :  { %v533_v41 = vsel %vm532_vm2, %v524_v39, -inf }
 0x1fb   :  { %534 = vmax.xlane.f32.xlu0 %v533_v41 }
 0x268   :  { %v1808_v42 = vpop.f32.mrf.mxu1 }
 0x269   :  { %v725_v45 = vadd.f32 %v1808_v42, %v2295_v34 }
 0x26a   :  { %v719_v43 = vpop.f32.mrf.mxu1 }
 0x26b   :  { %v720_v44 = vadd.f32 %v719_v43, %v2297_v36  ;;  %v731_v47 = vsel %vm532_vm2, %v725_v45, -inf }
 0x26d   :  { %v728_v46 = vsel %vm532_vm2, %v720_v44, -inf }
 0x26e   :  { %729 = vmax.xlane.f32.xlu0 %v728_v46 }
 0x272   :  { %732 = vmax.xlane.f32.xlu0 %v731_v47 }
 0x282   :  { %v538_v48 = vpop.xlane.xlu1 %537 }
 0x283   :  { %v540_v49 = vsub.f32 %v529_v37, %v538_v48 }
 0x284   :  { %v535_v50 = vpop.xlane.xlu0 %534 }
 0x285   :  { %v543_v51 = vmul.f32 1.442695, %v540_v49  ;;  %v539_v52 = vsub.f32 %v524_v39, %v535_v50 }
 0x287   :  { %1878 = vpow2.f32 %v543_v51  ;;  %v541_v53 = vmul.f32 1.442695, %v539_v52 }
 0x289   :  { %1880 = vpow2.f32 %v541_v53 }
 0x294   :  { %v1879_v57 = vpop.eup %1878 }
 0x295   :  { %v548_v58 = vsel %vm532_vm2, %v1879_v57, 0.0 }
 0x296   :  { %v1881_v59 = vpop.eup %1880  ;;  %549 = vadd.xlane.f32.xlu0 %v548_v58 }
 0x297   :  { %v545_v60 = vsel %vm532_vm2, %v1881_v59, 0.0 }
 0x298   :  { %546 = vadd.xlane.f32.xlu1 %v545_v60 }
 0x2f7   :  { %v730_v63 = vpop.xlane.xlu0 %729 }
 0x2f8   :  { %v734_v0 = vsub.f32 %v720_v44, %v730_v63 }
 0x2fa   :  { %v736_v1 = vmul.f32 1.442695, %v734_v0 }
 0x2fb   :  { %v733_v2 = vpop.xlane.xlu0 %732 }
 0x2fc   :  { %1882 = vpow2.f32 %v736_v1  ;;  %v735_v3 = vsub.f32 %v725_v45, %v733_v2 }
 0x2fe   :  { %v738_v4 = vmul.f32 1.442695, %v735_v3 }
 0x300   :  { %1884 = vpow2.f32 %v738_v4 }
 0x309   :  { %v1883_v5 = vpop.eup %1882 }
 0x30a   :  { %v740_v6 = vsel %vm532_vm2, %v1883_v5, 0.0 }
 0x30b   :  { %741 = vadd.xlane.f32.xlu1 %v740_v6 }
 0x30d   :  { %v1885_v7 = vpop.eup %1884 }
 0x30e   :  { %v743_v9 = vsel %vm532_vm2, %v1885_v7, 0.0 }
 0x30f   :  { %744 = vadd.xlane.f32.xlu0 %v743_v9 }
 0x31c   :  { %754 = vrot.lane.b32.xlu1 %v2310_v56, %s2116_s21 }
 0x31f   :  { %v550_v11 = vpop.xlane.xlu0 %549 }
 0x320   :  { %1008 = vrot.lane.b32.xlu1 %v2256_v15, %s2117_s9  ;;  %1886 = vrcp.f32 %v550_v11 }
 0x321   :  { %v547_v12 = vpop.xlane.xlu1 %546 }
 0x322   :  { %1888 = vrcp.f32 %v547_v12 }
 0x324   :  { %1006 = vrot.lane.b32.xlu1 %v2261_v20, %s2117_s9 }
 0x325   :  { %752 = vrot.lane.b32.xlu0 %v2316_v62, %s2116_s21 }
 0x328   :  { %1004 = vrot.lane.b32.xlu1 %v2281_v23, %s2117_s9 }
 0x329   :  { %1002 = vrot.lane.b32.xlu0 %v2269_v22, %s2117_s9 }
 0x32c   :  { %1290 = vrot.lane.b32.xlu1 %v2261_v20, %s2118_s22 }
 0x32d   :  { %1292 = vrot.lane.b32.xlu0 %v2256_v15, %s2118_s22  ;;  %v1887_v13 = vpop.eup %1886 }
 0x32e   :  { %v554_v17 = vmul.f32 %v1887_v13, %v1879_v57  ;;  %v1202_v13 = vld [vmem:[#allocation14 + $0x10] sm:$0xff] }
 0x32f   :  { %v1889_v14 = vpop.eup %1888 }
 0x330   :  { %1288 = vrot.lane.b32.xlu1 %v2281_v23, %s2118_s22  ;;  %v553_v16 = vmul.f32 %v1889_v14, %v1881_v59  ;;  %v839_v23 = vld [vmem:[#allocation14 + $0x8] sm:$0xff] }
 0x331   :  { %1286 = vrot.lane.b32.xlu0 %v2269_v22, %s2118_s22 }
 0x332   :  { %1799 = vmatprep.mubr.msk.f32.mxu0 %vm532_vm2, %v553_v16 }
 0x333   :  { %1800 = vmatmul.mubr.msk.f32.vlgmr.msra.gmra.mxu0 %vm532_vm2, %v554_v17 }
 0x394   :  { %v742_v19 = vpop.xlane.xlu1 %741 }
 0x395   :  { %1890 = vrcp.f32 %v742_v19 }
 0x398   :  { %v755_v15 = vpop.permute.xlu1 %754  ;;  %v745_v20 = vpop.xlane.xlu0 %744 }
 0x399   :  { %1892 = vrcp.f32 %v745_v20  ;;  %1809 = vmatprep.subr.mxu0 %v755_v15 }
 0x39a   :  { %1810 = vmatpush3.msra.mxu0 %v755_v15 }
 0x39c   :  { %v753_v21 = vpop.permute.xlu0 %752  ;;  %v1009_v27 = vpop.permute.xlu1 %1008 }
 0x39d   :  { %1811 = vmatprep.subr.mxu0 %v753_v21 }
 0x39e   :  { %1812 = vmatpush3.msra.mxu0 %v753_v21 }
 0x39f   :  { %1816 = vmatprep.subr.mxu0 %v839_v23 }
 0x3a0   :  { %v1003_v30 = vpop.permute.xlu0 %1002  ;;  %v1007_v32 = vpop.permute.xlu1 %1006 }
 0x3a2   :  { %v1891_v22 = vpop.eup %1890 }
 0x3a3   :  { %v748_v24 = vmul.f32 %v1891_v22, %v1883_v5 }
 0x3a4   :  { %v1293_v35 = vpop.permute.xlu0 %1292  ;;  %v1005_v37 = vpop.permute.xlu1 %1004 }
 0x3a5   :  { %1813 = vmatprep.mubr.msk.f32.mxu0 %vm532_vm2, %v748_v24 }
 0x3a6   :  { %v1893_v25 = vpop.eup %1892 }
 0x3a7   :  { %v749_v26 = vmul.f32 %v1893_v25, %v1885_v7 }
 0x3a8   :  { %v1287_v38 = vpop.permute.xlu0 %1286  ;;  %v1291_v39 = vpop.permute.xlu1 %1290 }
 0x3a9   :  { %1814 = vmatmul.mubr.msk.f32.vlgmr.msra.gmra.mxu0 %vm532_vm2, %v749_v26 }
 0x3aa   :  { %1817 = vmatpush3.msra.mxu0 %v839_v23 }
 0x3ab   :  { %1826 = vmatprep.subr.msk.mxu0 %vm444_vm1, %v1009_v27 }
 0x3ac   :  { %v1289_v40 = vpop.permute.xlu1 %1288 }
 0x3f3   :  { %v1801_v28 = vpop.f32.mrf.mxu0 }
 0x3f5   :  { %v627_v29 = vpop.f32.mrf.mxu0 }
 0x3f6   :  { %1823 = vmatprep.mubr.msk.f32.mxu1 %vm444_vm1, %v627_v29 }
 0x3f7   :  { %1824 = vmatmul.mubr.msk.f32.vlgmr.msra.gmra.mxu1 %vm444_vm1, %v1801_v28 }
 0x469   :  { %v1815_v31 = vpop.f32.mrf.mxu0 }
 0x46b   :  { %v830_v33 = vpop.f32.mrf.mxu0 }
 0x46c   :  { %1818 = vmatprep.mubr.msk.f32.mxu0 %vm444_vm1, %v830_v33 }
 0x46d   :  { %1819 = vmatmul.mubr.msk.f32.vlgmr.msra.gmra.mxu0 %vm444_vm1, %v1815_v31 }
 0x46e   :  { %1827 = vmatpush3.xpose.msk.msra.mxu0 %vm444_vm1, %v1009_v27  ;;  %1830 = vmatprep.mubr.msk.f32.mxu0 %vm444_vm1, %v1003_v30 }
 0x46f   :  { %1828 = vmatprep.subr.msk.mxu0 %vm444_vm1, %v1007_v32 }
 0x472   :  { %1829 = vmatpush3.xpose.msk.msra.mxu0 %vm444_vm1, %v1007_v32  ;;  %v1486_v32 = vld [vmem:[#allocation14 + $0x18] sm:$0xff] }
 0x473   :  { %1845 = vmatprep.subr.msk.mxu0 %vm444_vm1, %v1293_v35 }
 0x475   :  { %1831 = vmatmul.mubr.msk.f32.vlgmr.msra.gmra.mxu0 %vm444_vm1, %v1005_v37 }
 0x476   :  { %1846 = vmatpush3.xpose.msk.msra.mxu0 %vm444_vm1, %v1293_v35  ;;  %1849 = vmatprep.mubr.msk.f32.mxu0 %vm444_vm1, %v1287_v38 }
 0x477   :  { %1847 = vmatprep.subr.msk.mxu0 %vm444_vm1, %v1291_v39 }
 0x47a   :  { %1848 = vmatpush3.xpose.msk.msra.mxu0 %vm444_vm1, %v1291_v39 }
 0x47d   :  { %1850 = vmatmul.mubr.msk.f32.vlgmr.msra.gmra.mxu0 %vm444_vm1, %v1289_v40 }
 0x4b7   :  { %v1825_v22 = vpop.f32.mrf.mxu1 }
 0x4b9   :  { %v993_v24 = vpop.f32.mrf.mxu1 }
 0x52d   :  { %v2362_v41 = vpop.f32.mrf.mxu0 }
 0x52e   :  { %v999_v33 = vadd.f32 %v1825_v22, %v2362_v41 }
 0x52f   :  { %v2364_v42 = vpop.f32.mrf.mxu0 }
 0x530   :  { %v994_v37 = vadd.f32 %v993_v24, %v2364_v42 }
 0x535   :  { %v1832_v43 = vpop.f32.mrf.mxu0 }
 0x536   :  { %v1090_v44 = vadd.f32 %v1832_v43, %v2295_v34 }
 0x537   :  { %v1084_v45 = vpop.f32.mrf.mxu0 }
 0x538   :  { %v1085_v46 = vadd.f32 %v1084_v45, %v2297_v36  ;;  %v1096_v47 = vsel %vm532_vm2, %v1090_v44, -inf }
 0x539   :  { %1097 = vmax.xlane.f32.xlu1 %v1096_v47 }
 0x53a   :  { %v1093_v48 = vsel %vm532_vm2, %v1085_v46, -inf }
 0x53b   :  { %1094 = vmax.xlane.f32.xlu0 %v1093_v48 }
 0x53d   :  { %v1851_v49 = vpop.f32.mrf.mxu0 }
 0x53e   :  { %v1374_v5 = vadd.f32 %v1851_v49, %v2295_v34 }
 0x53f   :  { %v1368_v50 = vpop.f32.mrf.mxu0 }
 0x540   :  { %v1369_v51 = vadd.f32 %v1368_v50, %v2297_v36  ;;  %v1380_v7 = vsel %vm532_vm2, %v1374_v5, -inf }
 0x542   :  { %v1377_v52 = vsel %vm532_vm2, %v1369_v51, -inf }
 0x54a   :  { %1117 = vrot.lane.b32.xlu1 %v2310_v56, %s2117_s9 }
 0x56e   :  { %1378 = vmax.xlane.f32.xlu1 %v1377_v52 }
 0x5c2   :  { %v1098_v53 = vpop.xlane.xlu1 %1097 }
 0x5c3   :  { %v1100_v54 = vsub.f32 %v1090_v44, %v1098_v53 }
 0x5c4   :  { %v1095_v55 = vpop.xlane.xlu0 %1094 }
 0x5c5   :  { %v1103_v57 = vmul.f32 1.442695, %v1100_v54  ;;  %v1099_v58 = vsub.f32 %v1085_v46, %v1095_v55  ;;  %v1690_v46 = vld [vmem:[%s2430_s11] ss:$0 sm:$0xff] }
 0x5c6   :  { %v1118_v59 = vpop.permute.xlu1 %1117 }
 0x5c7   :  { %1894 = vpow2.f32 %v1103_v57  ;;  %v1101_v60 = vmul.f32 1.442695, %v1099_v58  ;;  %1833 = vmatprep.subr.mxu1 %v1118_v59 }
 0x5c8   :  { %1834 = vmatpush3.msra.mxu1 %v1118_v59 }
 0x5c9   :  { %1896 = vpow2.f32 %v1101_v60 }
 0x5d4   :  { %v1895_v61 = vpop.eup %1894 }
 0x5d5   :  { %v1108_v63 = vsel %vm532_vm2, %v1895_v61, 0.0 }
 0x5d6   :  { %v1897_v0 = vpop.eup %1896  ;;  %1109 = vadd.xlane.f32.xlu0 %v1108_v63 }
 0x5d7   :  { %v1105_v36 = vsel %vm532_vm2, %v1897_v0, 0.0 }
 0x5da   :  { %1106 = vadd.xlane.f32.xlu0 %v1105_v36 }
 0x5f0   :  { %1115 = vrot.lane.b32.xlu0 %v2316_v62, %s2117_s9 }
 0x5f7   :  { %v1379_v1 = vpop.xlane.xlu1 %1378 }
 0x5f8   :  { %v1383_v2 = vsub.f32 %v1369_v51, %v1379_v1 }
 0x5fa   :  { %v1385_v3 = vmul.f32 1.442695, %v1383_v2 }
 0x5fc   :  { %1898 = vpow2.f32 %v1385_v3 }
 0x609   :  { %v1899_v4 = vpop.eup %1898 }
 0x60a   :  { %v1389_v6 = vsel %vm532_vm2, %v1899_v4, 0.0 }
 0x60b   :  { %1390 = vadd.xlane.f32.xlu1 %v1389_v6  ;;  %v1691_v6 = vld [vmem:[%s2431_s12] ss:$0 sm:$0xff] }
 0x60f   :  { %1381 = vmax.xlane.f32.xlu0 %v1380_v7 }
 0x61c   :  { %1401 = vrot.lane.b32.xlu1 %v2310_v56, %s2118_s22 }
 0x65f   :  { %v1110_v9 = vpop.xlane.xlu0 %1109 }
 0x660   :  { %1900 = vrcp.f32 %v1110_v9 }
 0x663   :  { %v1107_v11 = vpop.xlane.xlu0 %1106 }
 0x664   :  { %1902 = vrcp.f32 %v1107_v11  ;;  %v1692_v11 = vld [vmem:[%s2432_s13] ss:$0 sm:$0xff] }
 0x667   :  { %v1116_v12 = vpop.permute.xlu0 %1115 }
 0x668   :  { %1835 = vmatprep.subr.mxu1 %v1116_v12 }
 0x669   :  { %1836 = vmatpush3.msra.mxu1 %v1116_v12 }
 0x66a   :  { %1840 = vmatprep.subr.mxu1 %v1202_v13 }
 0x66d   :  { %v1901_v14 = vpop.eup %1900 }
 0x66e   :  { %v1114_v17 = vmul.f32 %v1901_v14, %v1895_v61 }
 0x671   :  { %v1903_v34 = vpop.eup %1902 }
 0x672   :  { %v1113_v16 = vmul.f32 %v1903_v34, %v1897_v0 }
 0x674   :  { %1837 = vmatprep.mubr.msk.f32.mxu1 %vm532_vm2, %v1113_v16 }
 0x675   :  { %1838 = vmatmul.mubr.msk.f32.vlgmr.msra.gmra.mxu1 %vm532_vm2, %v1114_v17 }
 0x676   :  { %1841 = vmatpush3.msra.mxu1 %v1202_v13 }
 0x694   :  { %v1391_v18 = vpop.xlane.xlu1 %1390 }
 0x698   :  { %v1402_v56 = vpop.permute.xlu1 %1401  ;;  %v1382_v19 = vpop.xlane.xlu0 %1381 }
 0x699   :  { %v1384_v15 = vsub.f32 %v1374_v5, %v1382_v19  ;;  %1852 = vmatprep.subr.mxu1 %v1402_v56 }
 0x69b   :  { %v1387_v20 = vmul.f32 1.442695, %v1384_v15 }
 0x69d   :  { %1904 = vpow2.f32 %v1387_v20 }
 0x69e   :  { %1906 = vrcp.f32 %v1391_v18 }
 0x6aa   :  { %v1905_v21 = vpop.eup %1904 }
 0x6ab   :  { %v1392_v23 = vsel %vm532_vm2, %v1905_v21, 0.0  ;;  %v1907_v25 = vpop.eup %1906 }
 0x6ac   :  { %1393 = vadd.xlane.f32.xlu0 %v1392_v23  ;;  %v1397_v29 = vmul.f32 %v1907_v25, %v1899_v4 }
 0x6c2   :  { %1399 = vrot.lane.b32.xlu0 %v2316_v62, %s2118_s22 }
 0x735   :  { %v1839_v26 = vpop.f32.mrf.mxu1  ;;  %v1394_v27 = vpop.xlane.xlu0 %1393 }
 0x736   :  { %1908 = vrcp.f32 %v1394_v27 }
 0x737   :  { %v1193_v28 = vpop.f32.mrf.mxu1 }
 0x738   :  { %1842 = vmatprep.mubr.msk.f32.mxu1 %vm444_vm1, %v1193_v28 }
 0x739   :  { %1843 = vmatmul.mubr.msk.f32.vlgmr.msra.gmra.mxu1 %vm444_vm1, %v1839_v26  ;;  %v1400_v30 = vpop.permute.xlu0 %1399 }
 0x73a   :  { %1853 = vmatpush3.msra.mxu1 %v1402_v56  ;;  %1856 = vmatprep.mubr.msk.f32.mxu1 %vm532_vm2, %v1397_v29 }
 0x73b   :  { %1854 = vmatprep.subr.mxu1 %v1400_v30 }
 0x73c   :  { %1855 = vmatpush3.msra.mxu1 %v1400_v30 }
 0x73d   :  { %1859 = vmatprep.subr.mxu1 %v1486_v32 }
 0x743   :  { %v1909_v62 = vpop.eup %1908 }
 0x744   :  { %v1398_v31 = vmul.f32 %v1909_v62, %v1905_v21 }
 0x746   :  { %1857 = vmatmul.mubr.msk.f32.vlgmr.msra.gmra.mxu1 %vm532_vm2, %v1398_v31 }
 0x747   :  { %1860 = vmatpush3.msra.mxu1 %v1486_v32 }
 0x7f9   :  { %v1844_v35 = vpop.f32.mrf.mxu1 }
 0x7fa   :  { %v1285_v38 = vadd.f32 %v1844_v35, %v999_v33 }
 0x7fb   :  { %v1275_v39 = vpop.f32.mrf.mxu1 }
 0x7fc   :  { %v1284_v40 = vadd.f32 %v1275_v39, %v994_v37 }
 0x806   :  { %v1858_v43 = vpop.f32.mrf.mxu1 }
 0x808   :  { %v1477_v44 = vpop.f32.mrf.mxu1 }
 0x809   :  { %1861 = vmatprep.mubr.msk.f32.mxu1 %vm444_vm1, %v1477_v44 }
 0x80a   :  { %1862 = vmatmul.mubr.msk.f32.vlgmr.msra.gmra.mxu1 %vm444_vm1, %v1858_v43 }
 0x8ca   :  { %v1863_v45 = vpop.f32.mrf.mxu1 }
 0x8cb   :  { %v1569_v47 = vadd.f32 %v1863_v45, %v1285_v38 }
 0x8cc   :  { %v1559_v48 = vpop.f32.mrf.mxu1 }
 0x8cd   :  { %v1578_v41 = vadd.f32 %v1690_v46, %v1569_v47  ;;  %v1568_v49 = vadd.f32 %v1559_v48, %v1284_v40 }
 0x8cf   :  { %v1577_v50 = vadd.f32 %v1690_v46, %v1568_v49  ;;  %v1580_v42 = vadd.f32 %v1578_v41, %v2245_v10 }
 0x8d1   :  { %v1584_v51 = vsel %vm176_vm0, %v1580_v42, 0.0  ;;  %v1579_v52 = vadd.f32 %v1577_v50, %v2243_v8 }
 0x8d2   :  { %1585 = vadd.xlane.f32.xlu0 %v1584_v51 }
 0x8d3   :  { %v1581_v53 = vsel %vm176_vm0, %v1579_v52, 0.0 }
 0x8d4   :  { %1582 = vadd.xlane.f32.xlu1 %v1581_v53 }
 0x95b   :  { %v1586_v54 = vpop.xlane.xlu0 %1585 }
 0x95c   :  { %v1589_v55 = vmul.f32 0.03125, %v1586_v54 }
 0x95d   :  { %v1583_v57 = vpop.xlane.xlu1 %1582 }
 0x95e   :  { %v1591_v58 = vsub.f32 %v1580_v42, %v1589_v55  ;;  %v1588_v59 = vmul.f32 0.03125, %v1583_v57 }
 0x960   :  { %v1590_v60 = vsub.f32 %v1579_v52, %v1588_v59  ;;  %v1593_v61 = vmul.f32 %v1591_v58, %v1591_v58 }
 0x962   :  { %v1597_v63 = vsel %vm176_vm0, %v1593_v61, 0.0  ;;  %v1592_v0 = vmul.f32 %v1590_v60, %v1590_v60 }
 0x963   :  { %1598 = vadd.xlane.f32.xlu0 %v1597_v63 }
 0x964   :  { %v1594_v10 = vsel %vm176_vm0, %v1592_v0, 0.0 }
 0x965   :  { %1595 = vadd.xlane.f32.xlu1 %v1594_v10 }
 0x9ec   :  { %v1599_v36 = vpop.xlane.xlu0 %1598 }
 0x9ed   :  { %v1601_v8 = vmul.f32 0.03125, %v1599_v36 }
 0x9ee   :  { %v1596_v1 = vpop.xlane.xlu1 %1595 }
 0x9ef   :  { %v1603_v2 = vadd.f32 1e-05, %v1601_v8  ;;  %v1600_v3 = vmul.f32 0.03125, %v1596_v1 }
 0x9f1   :  { %1910 = vrsqrt.f32 %v1603_v2  ;;  %v1602_v4 = vadd.f32 1e-05, %v1600_v3 }
 0x9f3   :  { %1912 = vrsqrt.f32 %v1602_v4 }
 0x9fe   :  { %v1911_v5 = vpop.eup %1910 }
 0x9ff   :  { %v1607_v7 = vmul.f32 %v1911_v5, %v1591_v58 }
 0xa00   :  { %v1913_v9 = vpop.eup %1912 }
 0xa01   :  { %v1606_v12 = vmul.f32 %v1913_v9, %v1590_v60  ;;  %v1616_v13 = vmul.f32 %v1691_v6, %v1607_v7 }
 0xa03   :  { %v1615_v14 = vmul.f32 %v1691_v6, %v1606_v12  ;;  %v1625_v34 = vadd.f32 %v1692_v11, %v1616_v13 }
 0xa05   :  { %v1624_v16 = vadd.f32 %v1692_v11, %v1615_v14  ;;  %1627 = vst.msk [vmem:[#allocation16 + $0x8] sm:$0xff] %vm176_vm0, %v1625_v34 }
 0xa07   :  { %1626 = vst.msk [vmem:[#allocation16] sm:$0xff] %vm176_vm0, %v1624_v16 }
 0xa08   :  { %2085 = shalt.err (!%p2082_p2)
}
 0xa09   :  { %1639 = dma.vmem_to_hbm [thread:$0]  %s1634_s27, 256, %s2433_s14, [#allocation4], %s2108_s18, %s2108_s18, %s2109_s19  }
 0xa0a   :  { %2104 = dma.done.wait [#allocation4], 256  }
 0xa0b   :  { %2105 = vsyncadd [#allocation4], 4294967040 }
 0xa0c   :  { %1643 = vsyncpa [#allocation3], 1 }
 0xa0d   :  { %1644 = vsyncpa [#allocation6], 1 }
 0xa0e   :  { %1645 = vsyncpa [#allocation9], 1 }
 0xa0f   :  { %1646 = vsyncpa [#allocation12], 1 }
 0xa10   :  { %1647 = vsyncpa [#allocation15], 1 }
 0xa11   :  { %1648 = vsyncpa [#allocation4], 1 }

</bundles_post_ra>
